<compile_context>
chip_gen: v5e
topology: v5e:2x2
jax: 0.10.0
libtpu: 0.0.40
codegen_flags: <defaults>
</compile_context>

<pallas_src>
import functools

import jax
import jax.numpy as jnp
from jax.experimental import pallas as pl
from jax.experimental.pallas import tpu as pltpu

BN_EPS = 1e-5


def _make_fused_kernel(n_layers, inv_counts):
    """Fused (conv-as-matmul + training-mode BN + ReLU) x n_layers kernel body.

    Per layer the kernel receives 5 refs (all resident in VMEM):
      M_ref      : (Cin*Lin, Cout*Lout) banded conv matrix (stride/dilation/pad folded)
      pool_ref   : (Cout*Lout, Cout)    0/1 matrix: lane-group -> channel  (BN stats)
      expand_ref : (Cout, Cout*Lout)    0/1 matrix: channel -> lane-group  (BN apply)
      gamma_ref  : (1, Cout)
      beta_ref   : (1, Cout)
    """

    def kernel(*refs):
        x_ref = refs[0]
        out_ref = refs[-1]
        cur = x_ref[...]                                            # (B, C0*L0) f32
        for i in range(n_layers):
            m_ref, pool_ref, expand_ref, gamma_ref, beta_ref = refs[1 + 5 * i: 6 + 5 * i]

            # --- Conv1d (bias dropped: exactly cancelled by BN mean subtraction) ---
            y = jnp.dot(cur, m_ref[...], preferred_element_type=jnp.float32)  # (B, Cout*Lout)

            # --- BatchNorm1d (training): one-pass batch stats per channel ----------
            col_sum = jnp.sum(y, axis=0, keepdims=True)                       # (1, Cout*Lout)
            col_sumsq = jnp.sum(y * y, axis=0, keepdims=True)
            ch_sum = jnp.dot(col_sum, pool_ref[...],
                             preferred_element_type=jnp.float32)              # (1, Cout)
            ch_sumsq = jnp.dot(col_sumsq, pool_ref[...],
                               preferred_element_type=jnp.float32)
            mean = ch_sum * inv_counts[i]
            var = jnp.maximum(ch_sumsq * inv_counts[i] - mean * mean, 0.0)    # biased var
            scale = gamma_ref[...] * jax.lax.rsqrt(var + BN_EPS)              # (1, Cout)
            shift = beta_ref[...] - mean * scale
            scale_l = jnp.dot(scale, expand_ref[...],
                              preferred_element_type=jnp.float32)             # (1, Cout*Lout)
            shift_l = jnp.dot(shift, expand_ref[...],
                              preferred_element_type=jnp.float32)

            # --- single fused scale + shift + ReLU pass (lane-dense) ---------------
            cur = jnp.maximum(y * scale_l + shift_l, 0.0)

        out_ref[...] = cur                                          # one full-width store

    return kernel


def _conv_as_matmul_matrix(weight, l_in, stride, padding, dilation):
    """(Cout, Cin, K) conv weight -> banded (Cin*Lin, Cout*Lout) matrix.

    x_flat(B, Cin*Lin) @ M reproduces Conv1d(stride, padding, dilation); zero padding
    is folded into the band structure (taps that would read the pad region vanish).
    """
    c_out, c_in, k = weight.shape
    l_out = (l_in + 2 * padding - dilation * (k - 1) - 1) // stride + 1
    # Input index read by output position p, tap k:  j = p*stride + k*dilation - padding
    j_idx = (jnp.arange(l_out)[None, :] * stride
             + jnp.arange(k)[:, None] * dilation - padding)                   # (K, Lout)
    onehot = (j_idx[..., None] ==
              jnp.arange(l_in)[None, None, :]).astype(weight.dtype)           # (K, Lout, Lin)
    m = jnp.einsum('ock,kpj->cjop', weight, onehot)                            # (Cin,Lin,Cout,Lout)
    return m.reshape(c_in * l_in, c_out * l_out), l_out


def conv1d_block_forward(x, params, stride_ls, padding_ls, dilation_ls):
    """Replicates Conv1d_block.forward with a single fused Pallas kernel."""
    out = jnp.transpose(x, (0, 2, 1)) if x.shape[2] == 4 else x  # (B, 4, L) if one-hot
    b, c_in, l_in = out.shape
    x_flat = out.reshape(b, c_in * l_in)

    kernel_inputs = [x_flat]
    in_specs = [pl.BlockSpec(x_flat.shape, lambda i: (0, 0))]
    inv_counts = []
    for idx, (w, _bias, gamma, beta) in enumerate(params):   # _bias: cancelled by BN, unused
        c_out = w.shape[0]
        m, l_out = _conv_as_matmul_matrix(
            w, l_in, stride_ls[idx], padding_ls[idx], dilation_ls[idx])
        eye = jnp.eye(c_out, dtype=jnp.float32)
        pool = jnp.repeat(eye, l_out, axis=0)      # (Cout*Lout, Cout): lane-group -> channel
        expand = pool.T                            # (Cout, Cout*Lout): channel -> lane-group
        for a in (m, pool, expand, gamma.reshape(1, c_out), beta.reshape(1, c_out)):
            kernel_inputs.append(a)
            in_specs.append(pl.BlockSpec(a.shape, lambda i: (0, 0)))
        inv_counts.append(1.0 / float(b * l_out))
        c_in, l_in = c_out, l_out

    out_flat = pl.pallas_call(
        _make_fused_kernel(len(params), tuple(inv_counts)),
        out_shape=jax.ShapeDtypeStruct((b, c_in * l_in), jnp.float32),
        grid=(1,),
        in_specs=in_specs,
        out_specs=pl.BlockSpec((b, c_in * l_in), lambda i: (0, 0)),
        compiler_params=pltpu.CompilerParams(dimension_semantics=("arbitrary",)),
    )(*kernel_inputs)
    return out_flat.reshape(b, c_in, l_in)


def reference_forward(x, params, stride_ls, padding_ls, dilation_ls):
    """Pure-JAX reference: Conv1d(+bias) + training-mode BN + ReLU per layer."""
    out = jnp.transpose(x, (0, 2, 1)) if x.shape[2] == 4 else x
    for i, (w, bias, gamma, beta) in enumerate(params):
        y = jax.lax.conv_general_dilated(
            out, w, window_strides=(stride_ls[i],),
            padding=[(padding_ls[i], padding_ls[i])],
            rhs_dilation=(dilation_ls[i],),
            dimension_numbers=('NCH', 'OIH', 'NCH'))
        y = y + bias[None, :, None]
        mean = jnp.mean(y, axis=(0, 2), keepdims=True)
        var = jnp.mean(jnp.square(y - mean), axis=(0, 2), keepdims=True)
        y = (y - mean) * jax.lax.rsqrt(var + BN_EPS)
        y = y * gamma[None, :, None] + beta[None, :, None]
        out = jnp.maximum(y, 0.0)
    return out


if __name__ == "__main__":
    # Module config (nucleotide Conv1d_block usage: one-hot input, 2 conv blocks).
    channel_ls = [4, 8, 16]
    kernel_size = 3
    stride_ls = [2, 2]
    padding_ls = [1, 1]
    dilation_ls = [1, 1]

    key = jax.random.PRNGKey(0)
    params = []
    for i in range(len(channel_ls) - 1):
        key, k_w, k_b, k_g, k_be = jax.random.split(key, 5)
        c_in, c_out = channel_ls[i], channel_ls[i + 1]
        w = 0.1 * jax.random.normal(k_w, (c_out, c_in, kernel_size), jnp.float32)
        bias = 0.1 * jax.random.normal(k_b, (c_out,), jnp.float32)   # kept, cancelled by BN
        gamma = 1.0 + 0.1 * jax.random.normal(k_g, (c_out,), jnp.float32)
        beta = 0.1 * jax.random.normal(k_be, (c_out,), jnp.float32)
        params.append((w, bias, gamma, beta))

    # Input: (B, L, 4) — last dim 4 triggers the transpose in forward(), like PyTorch.
    key, kx = jax.random.split(key)
    x = jax.random.normal(kx, (2, 16, 4), jnp.float32)

    fwd = jax.jit(functools.partial(conv1d_block_forward,
                                    stride_ls=stride_ls,
                                    padding_ls=padding_ls,
                                    dilation_ls=dilation_ls))
    out = jax.block_until_ready(fwd(x, params))

    # L: 16 -> 8 -> 4 with (k=3, s=2, p=1, d=1); channels 4 -> 8 -> 16.
    assert out.shape == (2, 16, 4), out.shape
    assert bool(jnp.all(out >= 0.0))  # ReLU output is non-negative

    # Correctness vs. plain-JAX reference (which keeps the conv bias explicitly).
    ref = reference_forward(x, params, stride_ls, padding_ls, dilation_ls)
    assert bool(jnp.allclose(out, ref, atol=2e-2, rtol=2e-2)), \
        float(jnp.max(jnp.abs(out - ref)))

    print("KERNEL_OK")
</pallas_src>

<mosaic_0001>
module attributes {stable_mosaic.version = 11 : i64} {
  func.func @kernel(%arg0: i32, %arg1: memref<2x64xf32, #tpu.memory_space<vmem>>, %arg2: memref<64x64xf32, #tpu.memory_space<vmem>>, %arg3: memref<64x8xf32, #tpu.memory_space<vmem>>, %arg4: memref<8x64xf32, #tpu.memory_space<vmem>>, %arg5: memref<1x8xf32, #tpu.memory_space<vmem>>, %arg6: memref<1x8xf32, #tpu.memory_space<vmem>>, %arg7: memref<64x64xf32, #tpu.memory_space<vmem>>, %arg8: memref<64x16xf32, #tpu.memory_space<vmem>>, %arg9: memref<16x64xf32, #tpu.memory_space<vmem>>, %arg10: memref<1x16xf32, #tpu.memory_space<vmem>>, %arg11: memref<1x16xf32, #tpu.memory_space<vmem>>, %arg12: memref<2x64xf32, #tpu.memory_space<vmem>>) attributes {dimension_semantics = [#tpu.dimension_semantics<arbitrary>], iteration_bounds = array<i64: 1>, scalar_prefetch = 0 : i64, scratch_operands = 0 : i64, tpu.core_type = #tpu.core_type<tc>, window_params = [{pipeline_mode = #tpu.pipeline_mode<synchronous>, transform_indices = @transform_0, window_bounds = array<i64: 2, 64>}, {pipeline_mode = #tpu.pipeline_mode<synchronous>, transform_indices = @transform_1, window_bounds = array<i64: 64, 64>}, {pipeline_mode = #tpu.pipeline_mode<synchronous>, transform_indices = @transform_2, window_bounds = array<i64: 64, 8>}, {pipeline_mode = #tpu.pipeline_mode<synchronous>, transform_indices = @transform_3, window_bounds = array<i64: 8, 64>}, {pipeline_mode = #tpu.pipeline_mode<synchronous>, transform_indices = @transform_4, window_bounds = array<i64: 1, 8>}, {pipeline_mode = #tpu.pipeline_mode<synchronous>, transform_indices = @transform_5, window_bounds = array<i64: 1, 8>}, {pipeline_mode = #tpu.pipeline_mode<synchronous>, transform_indices = @transform_6, window_bounds = array<i64: 64, 64>}, {pipeline_mode = #tpu.pipeline_mode<synchronous>, transform_indices = @transform_7, window_bounds = array<i64: 64, 16>}, {pipeline_mode = #tpu.pipeline_mode<synchronous>, transform_indices = @transform_8, window_bounds = array<i64: 16, 64>}, {pipeline_mode = #tpu.pipeline_mode<synchronous>, transform_indices = @transform_9, window_bounds = array<i64: 1, 16>}, {pipeline_mode = #tpu.pipeline_mode<synchronous>, transform_indices = @transform_10, window_bounds = array<i64: 1, 16>}, {pipeline_mode = #tpu.pipeline_mode<synchronous>, transform_indices = @transform_11, window_bounds = array<i64: 2, 64>}]} {
    %c0 = arith.constant 0 : index
    %c0_0 = arith.constant 0 : index
    %0 = vector.load %arg1[%c0, %c0_0] : memref<2x64xf32, #tpu.memory_space<vmem>>, vector<2x64xf32>
    %c0_1 = arith.constant 0 : index
    %c0_2 = arith.constant 0 : index
    %1 = vector.load %arg2[%c0_1, %c0_2] : memref<64x64xf32, #tpu.memory_space<vmem>>, vector<64x64xf32>
    %cst = arith.constant dense<0.000000e+00> : vector<2x64xf32>
    %2 = tpu.matmul %0, %1, %cst {dimension_numbers = #tpu.dot_dimension_numbers<[1], [0], [0], [1], [0, 0, 1, 1], [], []>} : vector<2x64xf32>, vector<64x64xf32>, vector<2x64xf32> -> vector<2x64xf32>
    %cst_3 = arith.constant dense<0.000000e+00> : vector<64xf32>
    %3 = vector.multi_reduction <add>, %2, %cst_3 [0] : vector<2x64xf32> to vector<64xf32>
    %4 = vector.shape_cast %3 : vector<64xf32> to vector<1x64xf32>
    %5 = arith.mulf %2, %2 : vector<2x64xf32>
    %cst_4 = arith.constant dense<0.000000e+00> : vector<64xf32>
    %6 = vector.multi_reduction <add>, %5, %cst_4 [0] : vector<2x64xf32> to vector<64xf32>
    %7 = vector.shape_cast %6 : vector<64xf32> to vector<1x64xf32>
    %c0_5 = arith.constant 0 : index
    %c0_6 = arith.constant 0 : index
    %8 = vector.load %arg3[%c0_5, %c0_6] : memref<64x8xf32, #tpu.memory_space<vmem>>, vector<64x8xf32>
    %cst_7 = arith.constant dense<0.000000e+00> : vector<1x8xf32>
    %9 = tpu.matmul %4, %8, %cst_7 {dimension_numbers = #tpu.dot_dimension_numbers<[1], [0], [0], [1], [0, 0, 1, 1], [], []>} : vector<1x64xf32>, vector<64x8xf32>, vector<1x8xf32> -> vector<1x8xf32>
    %c0_8 = arith.constant 0 : index
    %c0_9 = arith.constant 0 : index
    %10 = vector.load %arg3[%c0_8, %c0_9] : memref<64x8xf32, #tpu.memory_space<vmem>>, vector<64x8xf32>
    %cst_10 = arith.constant dense<0.000000e+00> : vector<1x8xf32>
    %11 = tpu.matmul %7, %10, %cst_10 {dimension_numbers = #tpu.dot_dimension_numbers<[1], [0], [0], [1], [0, 0, 1, 1], [], []>} : vector<1x64xf32>, vector<64x8xf32>, vector<1x8xf32> -> vector<1x8xf32>
    %cst_11 = arith.constant 6.250000e-02 : f32
    %12 = vector.broadcast %cst_11 : f32 to vector<1x8xf32>
    %13 = arith.mulf %9, %12 : vector<1x8xf32>
    %cst_12 = arith.constant 6.250000e-02 : f32
    %14 = vector.broadcast %cst_12 : f32 to vector<1x8xf32>
    %15 = arith.mulf %11, %14 : vector<1x8xf32>
    %16 = arith.mulf %13, %13 : vector<1x8xf32>
    %17 = arith.subf %15, %16 : vector<1x8xf32>
    %cst_13 = arith.constant 0.000000e+00 : f32
    %18 = vector.broadcast %cst_13 : f32 to vector<1x8xf32>
    %19 = arith.maximumf %17, %18 : vector<1x8xf32>
    %c0_14 = arith.constant 0 : index
    %c0_15 = arith.constant 0 : index
    %20 = vector.load %arg5[%c0_14, %c0_15] : memref<1x8xf32, #tpu.memory_space<vmem>>, vector<1x8xf32>
    %cst_16 = arith.constant 9.99999974E-6 : f32
    %21 = vector.broadcast %cst_16 : f32 to vector<1x8xf32>
    %22 = arith.addf %19, %21 : vector<1x8xf32>
    %23 = math.rsqrt %22 : vector<1x8xf32>
    %24 = arith.mulf %20, %23 : vector<1x8xf32>
    %c0_17 = arith.constant 0 : index
    %c0_18 = arith.constant 0 : index
    %25 = vector.load %arg6[%c0_17, %c0_18] : memref<1x8xf32, #tpu.memory_space<vmem>>, vector<1x8xf32>
    %26 = arith.mulf %13, %24 : vector<1x8xf32>
    %27 = arith.subf %25, %26 : vector<1x8xf32>
    %c0_19 = arith.constant 0 : index
    %c0_20 = arith.constant 0 : index
    %28 = vector.load %arg4[%c0_19, %c0_20] : memref<8x64xf32, #tpu.memory_space<vmem>>, vector<8x64xf32>
    %cst_21 = arith.constant dense<0.000000e+00> : vector<1x64xf32>
    %29 = tpu.matmul %24, %28, %cst_21 {dimension_numbers = #tpu.dot_dimension_numbers<[1], [0], [0], [1], [0, 0, 1, 1], [], []>} : vector<1x8xf32>, vector<8x64xf32>, vector<1x64xf32> -> vector<1x64xf32>
    %c0_22 = arith.constant 0 : index
    %c0_23 = arith.constant 0 : index
    %30 = vector.load %arg4[%c0_22, %c0_23] : memref<8x64xf32, #tpu.memory_space<vmem>>, vector<8x64xf32>
    %cst_24 = arith.constant dense<0.000000e+00> : vector<1x64xf32>
    %31 = tpu.matmul %27, %30, %cst_24 {dimension_numbers = #tpu.dot_dimension_numbers<[1], [0], [0], [1], [0, 0, 1, 1], [], []>} : vector<1x8xf32>, vector<8x64xf32>, vector<1x64xf32> -> vector<1x64xf32>
    %32 = vector.broadcast %29 : vector<1x64xf32> to vector<2x64xf32>
    %33 = arith.mulf %2, %32 : vector<2x64xf32>
    %34 = vector.broadcast %31 : vector<1x64xf32> to vector<2x64xf32>
    %35 = arith.addf %33, %34 : vector<2x64xf32>
    %cst_25 = arith.constant 0.000000e+00 : f32
    %36 = vector.broadcast %cst_25 : f32 to vector<2x64xf32>
    %37 = arith.maximumf %35, %36 : vector<2x64xf32>
    %c0_26 = arith.constant 0 : index
    %c0_27 = arith.constant 0 : index
    %38 = vector.load %arg7[%c0_26, %c0_27] : memref<64x64xf32, #tpu.memory_space<vmem>>, vector<64x64xf32>
    %cst_28 = arith.constant dense<0.000000e+00> : vector<2x64xf32>
    %39 = tpu.matmul %37, %38, %cst_28 {dimension_numbers = #tpu.dot_dimension_numbers<[1], [0], [0], [1], [0, 0, 1, 1], [], []>} : vector<2x64xf32>, vector<64x64xf32>, vector<2x64xf32> -> vector<2x64xf32>
    %cst_29 = arith.constant dense<0.000000e+00> : vector<64xf32>
    %40 = vector.multi_reduction <add>, %39, %cst_29 [0] : vector<2x64xf32> to vector<64xf32>
    %41 = vector.shape_cast %40 : vector<64xf32> to vector<1x64xf32>
    %42 = arith.mulf %39, %39 : vector<2x64xf32>
    %cst_30 = arith.constant dense<0.000000e+00> : vector<64xf32>
    %43 = vector.multi_reduction <add>, %42, %cst_30 [0] : vector<2x64xf32> to vector<64xf32>
    %44 = vector.shape_cast %43 : vector<64xf32> to vector<1x64xf32>
    %c0_31 = arith.constant 0 : index
    %c0_32 = arith.constant 0 : index
    %45 = vector.load %arg8[%c0_31, %c0_32] : memref<64x16xf32, #tpu.memory_space<vmem>>, vector<64x16xf32>
    %cst_33 = arith.constant dense<0.000000e+00> : vector<1x16xf32>
    %46 = tpu.matmul %41, %45, %cst_33 {dimension_numbers = #tpu.dot_dimension_numbers<[1], [0], [0], [1], [0, 0, 1, 1], [], []>} : vector<1x64xf32>, vector<64x16xf32>, vector<1x16xf32> -> vector<1x16xf32>
    %c0_34 = arith.constant 0 : index
    %c0_35 = arith.constant 0 : index
    %47 = vector.load %arg8[%c0_34, %c0_35] : memref<64x16xf32, #tpu.memory_space<vmem>>, vector<64x16xf32>
    %cst_36 = arith.constant dense<0.000000e+00> : vector<1x16xf32>
    %48 = tpu.matmul %44, %47, %cst_36 {dimension_numbers = #tpu.dot_dimension_numbers<[1], [0], [0], [1], [0, 0, 1, 1], [], []>} : vector<1x64xf32>, vector<64x16xf32>, vector<1x16xf32> -> vector<1x16xf32>
    %cst_37 = arith.constant 1.250000e-01 : f32
    %49 = vector.broadcast %cst_37 : f32 to vector<1x16xf32>
    %50 = arith.mulf %46, %49 : vector<1x16xf32>
    %cst_38 = arith.constant 1.250000e-01 : f32
    %51 = vector.broadcast %cst_38 : f32 to vector<1x16xf32>
    %52 = arith.mulf %48, %51 : vector<1x16xf32>
    %53 = arith.mulf %50, %50 : vector<1x16xf32>
    %54 = arith.subf %52, %53 : vector<1x16xf32>
    %cst_39 = arith.constant 0.000000e+00 : f32
    %55 = vector.broadcast %cst_39 : f32 to vector<1x16xf32>
    %56 = arith.maximumf %54, %55 : vector<1x16xf32>
    %c0_40 = arith.constant 0 : index
    %c0_41 = arith.constant 0 : index
    %57 = vector.load %arg10[%c0_40, %c0_41] : memref<1x16xf32, #tpu.memory_space<vmem>>, vector<1x16xf32>
    %cst_42 = arith.constant 9.99999974E-6 : f32
    %58 = vector.broadcast %cst_42 : f32 to vector<1x16xf32>
    %59 = arith.addf %56, %58 : vector<1x16xf32>
    %60 = math.rsqrt %59 : vector<1x16xf32>
    %61 = arith.mulf %57, %60 : vector<1x16xf32>
    %c0_43 = arith.constant 0 : index
    %c0_44 = arith.constant 0 : index
    %62 = vector.load %arg11[%c0_43, %c0_44] : memref<1x16xf32, #tpu.memory_space<vmem>>, vector<1x16xf32>
    %63 = arith.mulf %50, %61 : vector<1x16xf32>
    %64 = arith.subf %62, %63 : vector<1x16xf32>
    %c0_45 = arith.constant 0 : index
    %c0_46 = arith.constant 0 : index
    %65 = vector.load %arg9[%c0_45, %c0_46] : memref<16x64xf32, #tpu.memory_space<vmem>>, vector<16x64xf32>
    %cst_47 = arith.constant dense<0.000000e+00> : vector<1x64xf32>
    %66 = tpu.matmul %61, %65, %cst_47 {dimension_numbers = #tpu.dot_dimension_numbers<[1], [0], [0], [1], [0, 0, 1, 1], [], []>} : vector<1x16xf32>, vector<16x64xf32>, vector<1x64xf32> -> vector<1x64xf32>
    %c0_48 = arith.constant 0 : index
    %c0_49 = arith.constant 0 : index
    %67 = vector.load %arg9[%c0_48, %c0_49] : memref<16x64xf32, #tpu.memory_space<vmem>>, vector<16x64xf32>
    %cst_50 = arith.constant dense<0.000000e+00> : vector<1x64xf32>
    %68 = tpu.matmul %64, %67, %cst_50 {dimension_numbers = #tpu.dot_dimension_numbers<[1], [0], [0], [1], [0, 0, 1, 1], [], []>} : vector<1x16xf32>, vector<16x64xf32>, vector<1x64xf32> -> vector<1x64xf32>
    %69 = vector.broadcast %66 : vector<1x64xf32> to vector<2x64xf32>
    %70 = arith.mulf %39, %69 : vector<2x64xf32>
    %71 = vector.broadcast %68 : vector<1x64xf32> to vector<2x64xf32>
    %72 = arith.addf %70, %71 : vector<2x64xf32>
    %cst_51 = arith.constant 0.000000e+00 : f32
    %73 = vector.broadcast %cst_51 : f32 to vector<2x64xf32>
    %74 = arith.maximumf %72, %73 : vector<2x64xf32>
    %c0_52 = arith.constant 0 : index
    %c0_53 = arith.constant 0 : index
    %75 = vector.load %arg12[%c0_52, %c0_53] : memref<2x64xf32, #tpu.memory_space<vmem>>, vector<2x64xf32>
    tpu.vector_store %arg12[%c0_52, %c0_53], %74 {strides = array<i32>} : memref<2x64xf32, #tpu.memory_space<vmem>>, vector<2x64xf32>,
    return
  }
  func.func @transform_0(%arg0: i32) -> (i32, i32) {
    %c0_i32 = arith.constant 0 : i32
    %c0_i32_0 = arith.constant 0 : i32
    %c0_i32_1 = arith.constant 0 : i32
    return %c0_i32, %c0_i32_0 : i32, i32
  }
  func.func @transform_1(%arg0: i32) -> (i32, i32) {
    %c0_i32 = arith.constant 0 : i32
    %c0_i32_0 = arith.constant 0 : i32
    %c0_i32_1 = arith.constant 0 : i32
    return %c0_i32, %c0_i32_0 : i32, i32
  }
  func.func @transform_2(%arg0: i32) -> (i32, i32) {
    %c0_i32 = arith.constant 0 : i32
    %c0_i32_0 = arith.constant 0 : i32
    %c0_i32_1 = arith.constant 0 : i32
    return %c0_i32, %c0_i32_0 : i32, i32
  }
  func.func @transform_3(%arg0: i32) -> (i32, i32) {
    %c0_i32 = arith.constant 0 : i32
    %c0_i32_0 = arith.constant 0 : i32
    %c0_i32_1 = arith.constant 0 : i32
    return %c0_i32, %c0_i32_0 : i32, i32
  }
  func.func @transform_4(%arg0: i32) -> (i32, i32) {
    %c0_i32 = arith.constant 0 : i32
    %c0_i32_0 = arith.constant 0 : i32
    %c0_i32_1 = arith.constant 0 : i32
    return %c0_i32, %c0_i32_0 : i32, i32
  }
  func.func @transform_5(%arg0: i32) -> (i32, i32) {
    %c0_i32 = arith.constant 0 : i32
    %c0_i32_0 = arith.constant 0 : i32
    %c0_i32_1 = arith.constant 0 : i32
    return %c0_i32, %c0_i32_0 : i32, i32
  }
  func.func @transform_6(%arg0: i32) -> (i32, i32) {
    %c0_i32 = arith.constant 0 : i32
    %c0_i32_0 = arith.constant 0 : i32
    %c0_i32_1 = arith.constant 0 : i32
    return %c0_i32, %c0_i32_0 : i32, i32
  }
  func.func @transform_7(%arg0: i32) -> (i32, i32) {
    %c0_i32 = arith.constant 0 : i32
    %c0_i32_0 = arith.constant 0 : i32
    %c0_i32_1 = arith.constant 0 : i32
    return %c0_i32, %c0_i32_0 : i32, i32
  }
  func.func @transform_8(%arg0: i32) -> (i32, i32) {
    %c0_i32 = arith.constant 0 : i32
    %c0_i32_0 = arith.constant 0 : i32
    %c0_i32_1 = arith.constant 0 : i32
    return %c0_i32, %c0_i32_0 : i32, i32
  }
  func.func @transform_9(%arg0: i32) -> (i32, i32) {
    %c0_i32 = arith.constant 0 : i32
    %c0_i32_0 = arith.constant 0 : i32
    %c0_i32_1 = arith.constant 0 : i32
    return %c0_i32, %c0_i32_0 : i32, i32
  }
  func.func @transform_10(%arg0: i32) -> (i32, i32) {
    %c0_i32 = arith.constant 0 : i32
    %c0_i32_0 = arith.constant 0 : i32
    %c0_i32_1 = arith.constant 0 : i32
    return %c0_i32, %c0_i32_0 : i32, i32
  }
  func.func @transform_11(%arg0: i32) -> (i32, i32) {
    %c0_i32 = arith.constant 0 : i32
    %c0_i32_0 = arith.constant 0 : i32
    %c0_i32_1 = arith.constant 0 : i32
    return %c0_i32, %c0_i32_0 : i32, i32
  }
}

</mosaic_0001>

<bundles_post_ra>
// kernel: conv1d_block_forward.1
= control target key start
LH: loop header
LB: loop body
LE: loop exit
PB: predicated region body
PF: predicated region fallthrough
CT: control target
= control target key end

     0   :  { %vm47_vm0 = vcmask 523264   ;;  %vm71_vm1 = vcmask 517120   ;;  %vm163_vm5 = vcmask 64512   ;;  %vm338_vm9 = vcmask 130048   ;;  %s609_s1 = inlined_call_operand.vmem [shape: f32[64,64], index: 1, kind: input, shape index: {}]   ;;  %s610_s2 = inlined_call_operand.vmem [shape: f32[64,8], index: 2, kind: input, shape index: {}]   ;;  %s611_s0 = inlined_call_operand.vmem [shape: f32[2,64], index: 0, kind: input, shape index: {}]   ;;  %s612_s3 = inlined_call_operand.vmem [shape: f32[8,64], index: 3, kind: input, shape index: {}]   ;;  %s613_s4 = inlined_call_operand.vmem [shape: f32[1,8], index: 4, kind: input, shape index: {}]   ;;  %s614_s5 = inlined_call_operand.vmem [shape: f32[1,8], index: 5, kind: input, shape index: {}]   ;;  %s615_s6 = inlined_call_operand.vmem [shape: f32[64,64], index: 6, kind: input, shape index: {}]   ;;  %s616_s7 = inlined_call_operand.vmem [shape: f32[64,16], index: 7, kind: input, shape index: {}]   ;;  %s617_s8 = inlined_call_operand.vmem [shape: f32[16,64], index: 8, kind: input, shape index: {}]   ;;  %s618_s9 = inlined_call_operand.vmem [shape: f32[1,16], index: 9, kind: input, shape index: {}]   ;;  %s619_s10 = inlined_call_operand.vmem [shape: f32[1,16], index: 10, kind: input, shape index: {}]   ;;  %s620_s11 = inlined_call_operand.vmem [shape: f32[2,64], index: 11, kind: output, shape index: {}]  }
   0x1   :  { %v46_v0 = vld [vmem:[%s609_s1 + $0x38] sm:$0xff]  ;;  %v45_v1 = vld [vmem:[%s609_s1 + $0x30] sm:$0xff]  ;;  %v44_v2 = vld [vmem:[%s609_s1 + $0x28] sm:$0xff] }
   0x2   :  { %59 = vmatpush.msra.mxu0 %v46_v0  ;;  %v94_v3 = vld [vmem:[%s610_s2 + $0x38] sm:$0xff]  ;;  %v43_v4 = vld [vmem:[%s609_s1 + $0x20] sm:$0xff]  ;;  %v41_v6 = vld [vmem:[%s609_s1 + $0x10] sm:$0xff] }
   0x3   :  { %106 = vmatpush.msra.mxu1 %v94_v3  ;;  %129 = vmatpush.msra.mxu2 %v94_v3  ;;  %v42_v5 = vld [vmem:[%s609_s1 + $0x18] sm:$0xff]  ;;  %v40_v7 = vld [vmem:[%s609_s1 + $0x8] sm:$0xff]  ;;  %v39_v8 = vld [vmem:[%s609_s1] sm:$0xff] }
   0x4   :  { %60 = vmatpush.msra.mxu0 %v45_v1  ;;  %v38_v9 = vld [vmem:[%s611_s0] sm:$0x3]  ;;  %v93_v10 = vld [vmem:[%s610_s2 + $0x30] sm:$0xff]  ;;  %v92_v11 = vld [vmem:[%s610_s2 + $0x28] sm:$0xff] }
   0x5   :  { %107 = vmatpush.msra.mxu1 %v93_v10  ;;  %130 = vmatpush.msra.mxu2 %v93_v10  ;;  %v91_v12 = vld [vmem:[%s610_s2 + $0x20] sm:$0xff]  ;;  %v90_v13 = vld [vmem:[%s610_s2 + $0x18] sm:$0xff]  ;;  %v89_v14 = vld [vmem:[%s610_s2 + $0x10] sm:$0xff] }
   0x6   :  { %61 = vmatpush.msra.mxu0 %v44_v2  ;;  %v88_v15 = vld [vmem:[%s610_s2 + $0x8] sm:$0xff]  ;;  %v87_v16 = vld [vmem:[%s610_s2] sm:$0xff]  ;;  %v222_v54 = vld [vmem:[%s615_s6 + $0x38] sm:$0xff] }
   0x7   :  { %108 = vmatpush.msra.mxu1 %v92_v11  ;;  %131 = vmatpush.msra.mxu2 %v92_v11  ;;  %v162_v33 = vld [vmem:[%s612_s3] sm:$0xff]  ;;  %v221_v55 = vld [vmem:[%s615_s6 + $0x30] sm:$0xff]  ;;  %v220_v56 = vld [vmem:[%s615_s6 + $0x28] sm:$0xff] }
   0x8   :  { %62 = vmatpush.msra.mxu0 %v43_v4  ;;  %182 = vmatpush.msra.mxu3 %v162_v33  ;;  %v146_v47 = vld [vmem:[%s613_s4] sm:$0x1]  ;;  %v218_v58 = vld [vmem:[%s615_s6 + $0x18] sm:$0xff]  ;;  %v217_v59 = vld [vmem:[%s615_s6 + $0x10] sm:$0xff] }
   0x9   :  { %109 = vmatpush.msra.mxu1 %v91_v12  ;;  %132 = vmatpush.msra.mxu2 %v91_v12  ;;  %v159_v52 = vld [vmem:[%s614_s5] sm:$0x1]  ;;  %v216_v60 = vld [vmem:[%s615_s6 + $0x8] sm:$0xff]  ;;  %v268_v62 = vld [vmem:[%s616_s7 + $0x38] sm:$0xff] }
   0xa   :  { %63 = vmatpush.msra.mxu0 %v42_v5  ;;  %205 = vmatpush.msrb.mxu3 %v162_v33  ;;  %v219_v57 = vld [vmem:[%s615_s6 + $0x20] sm:$0xff]  ;;  %v263_v10 = vld [vmem:[%s616_s7 + $0x10] sm:$0xff]  ;;  %v262_v11 = vld [vmem:[%s616_s7 + $0x8] sm:$0xff] }
   0xb   :  { %110 = vmatpush.msra.mxu1 %v90_v13  ;;  %133 = vmatpush.msra.mxu2 %v90_v13  ;;  %v215_v61 = vld [vmem:[%s615_s6] sm:$0xff] }
   0xc   :  { %64 = vmatpush.msra.mxu0 %v41_v6  ;;  %v267_v6 = vld [vmem:[%s616_s7 + $0x30] sm:$0xff]  ;;  %v261_v12 = vld [vmem:[%s616_s7] sm:$0xff] }
   0xd   :  { %111 = vmatpush.msra.mxu1 %v89_v14  ;;  %134 = vmatpush.msra.mxu2 %v89_v14 }
   0xe   :  { %65 = vmatpush.msra.mxu0 %v40_v7  ;;  %v266_v7 = vld [vmem:[%s616_s7 + $0x28] sm:$0xff] }
   0xf   :  { %112 = vmatpush.msra.mxu1 %v88_v15  ;;  %135 = vmatpush.msra.mxu2 %v88_v15 }
  0x10   :  { %66 = vmatpush.msra.mxu0 %v39_v8  ;;  %v265_v8 = vld [vmem:[%s616_s7 + $0x20] sm:$0xff] }
  0x11   :  { %395 = vmatmul.msk.f32.vlgmr.msra.gmra.mxu0 %vm47_vm0, %v38_v9  ;;  %113 = vmatpush.msra.mxu1 %v87_v16  ;;  %v264_v9 = vld [vmem:[%s616_s7 + $0x18] sm:$0xff] }
  0x12   :  { %136 = vmatpush.msra.mxu2 %v87_v16  ;;  %280 = vmatpush.msrb.mxu0 %v268_v62 }
  0x13   :  { %303 = vmatpush.msrb.mxu1 %v268_v62 }
  0x14   :  { %281 = vmatpush.msrb.mxu0 %v267_v6 }
  0x15   :  { %304 = vmatpush.msrb.mxu1 %v267_v6 }
  0x16   :  { %282 = vmatpush.msrb.mxu0 %v266_v7 }
  0x17   :  { %305 = vmatpush.msrb.mxu1 %v266_v7 }
  0x18   :  { %283 = vmatpush.msrb.mxu0 %v265_v8 }
  0x19   :  { %306 = vmatpush.msrb.mxu1 %v265_v8 }
  0x1a   :  { %284 = vmatpush.msrb.mxu0 %v264_v9 }
  0x1b   :  { %307 = vmatpush.msrb.mxu1 %v264_v9 }
  0x1c   :  { %285 = vmatpush.msrb.mxu0 %v263_v10 }
  0x1d   :  { %308 = vmatpush.msrb.mxu1 %v263_v10 }
  0x1e   :  { %286 = vmatpush.msrb.mxu0 %v262_v11 }
  0x1f   :  { %309 = vmatpush.msrb.mxu1 %v262_v11 }
  0x20   :  { %287 = vmatpush.msrb.mxu0 %v261_v12 }
  0x21   :  { %310 = vmatpush.msrb.mxu1 %v261_v12 }
  0x8e   :  { %v521_v17 = vpop.f32.mrf.mxu0 }
  0x8f   :  { %v72_v18 = vsel %vm71_vm1, %v521_v17, 0.0  ;;  %v79_v19 = vmul.f32 %v521_v17, %v521_v17 }
  0x90   :  { %v73_v20 = vrot.slane %v72_v18, 4 }
  0x91   :  { %v80_v21 = vsel %vm71_vm1, %v79_v19, 0.0 }
  0x92   :  { %v74_v22 = vadd.f32 %v73_v20, %v72_v18  ;;  %v81_v23 = vrot.slane %v80_v21, 4 }
  0x94   :  { %v75_v24 = vrot.slane %v74_v22, 2  ;;  %v82_v25 = vadd.f32 %v81_v23, %v80_v21 }
  0x96   :  { %v76_v26 = vadd.f32 %v75_v24, %v74_v22  ;;  %v83_v27 = vrot.slane %v82_v25, 2 }
  0x98   :  { %v77_v28 = vrot.slane %v76_v26, 1  ;;  %v84_v29 = vadd.f32 %v83_v27, %v82_v25 }
  0x9a   :  { %v78_v30 = vadd.f32 %v77_v28, %v76_v26  ;;  %v85_v31 = vrot.slane %v84_v29, 1 }
  0x9c   :  { %396 = vmatmul.msk.f32.vlgmr.msra.gmra.mxu1 %vm47_vm0, %v78_v30  ;;  %v86_v32 = vadd.f32 %v85_v31, %v84_v29  ;;  %v337_v29 = vld [vmem:[%s617_s8 + $0x8] sm:$0xff]  ;;  %v336_v30 = vld [vmem:[%s617_s8] sm:$0xff] }
  0x9d   :  { %356 = vmatpush.msrb.mxu2 %v337_v29 }
  0x9e   :  { %397 = vmatmul.msk.f32.vlgmr.msra.gmra.mxu2 %vm47_vm0, %v86_v32 }
  0x9f   :  { %357 = vmatpush.msrb.mxu2 %v336_v30 }
  0xa1   :  { %379 = vmatpush.msra.mxu2 %v337_v29 }
  0xa3   :  { %380 = vmatpush.msra.mxu2 %v336_v30 }
 0x119   :  { %v115_v34 = vpop.f32.mrf.mxu1 }
 0x11a   :  { %v141_v35 = vmul.f32 0.0625, %v115_v34 }
 0x11c   :  { %v143_v37 = vmul.f32 %v141_v35, %v141_v35 }
 0x121   :  { %v138_v36 = vpop.f32.mrf.mxu2 }
 0x122   :  { %v142_v38 = vmul.f32 0.0625, %v138_v36 }
 0x124   :  { %v144_v39 = vsub.f32 %v142_v38, %v143_v37 }
 0x126   :  { %v145_v40 = vmax.f32 %v144_v39, 0.0 }
 0x128   :  { %v147_v41 = vadd.f32 1e-05, %v145_v40 }
 0x12a   :  { %405 = vrsqrt.f32 %v147_v41  ;;  %vm154_vm3 = vweird.f32 %v147_v41 }
 0x130   :  { %v406_v42 = vpop.eup %405 }
 0x131   :  { %v149_v43 = vmul.f32 %v406_v42, %v147_v41  ;;  %vm155_vm2 = vweird.f32 %v406_v42 }
 0x132   :  { %vm156_vm4 = vmor %vm154_vm3, %vm155_vm2 }
 0x133   :  { %v150_v44 = vmul.f32 %v406_v42, %v149_v43 }
 0x135   :  { %v151_v45 = vmul.f32 0.5, %v150_v44 }
 0x137   :  { %v152_v46 = vsub.f32 1.5, %v151_v45  ;;  %v320_v45 = vld [vmem:[%s618_s9] sm:$0x1] }
 0x139   :  { %v153_v48 = vmul.f32 %v406_v42, %v152_v46 }
 0x13b   :  { %v157_v49 = vsel %vm156_vm4, %v406_v42, %v153_v48 }
 0x13c   :  { %v158_v50 = vmul.f32 %v157_v49, %v146_v47  ;;  %v333_v49 = vld [vmem:[%s619_s10] sm:$0x1] }
 0x13e   :  { %398 = vmatmul.msk.f32.vlgmr.msra.gmra.mxu3 %vm163_vm5, %v158_v50  ;;  %v160_v51 = vmul.f32 %v158_v50, %v141_v35 }
 0x13f   :  { %234 = vmatpush.msra.mxu3 %v222_v54 }
 0x140   :  { %v161_v53 = vsub.f32 %v159_v52, %v160_v51 }
 0x141   :  { %235 = vmatpush.msra.mxu3 %v221_v55 }
 0x143   :  { %236 = vmatpush.msra.mxu3 %v220_v56 }
 0x145   :  { %237 = vmatpush.msra.mxu3 %v219_v57 }
 0x146   :  { %399 = vmatmul.msk.f32.vlgmr.msrb.gmra.mxu3 %vm163_vm5, %v161_v53 }
 0x147   :  { %238 = vmatpush.msra.mxu3 %v218_v58 }
 0x149   :  { %239 = vmatpush.msra.mxu3 %v217_v59 }
 0x14b   :  { %240 = vmatpush.msra.mxu3 %v216_v60 }
 0x14d   :  { %241 = vmatpush.msra.mxu3 %v215_v61 }
 0x1c1   :  { %v184_v63 = vpop.f32.mrf.mxu3 }
 0x1c2   :  { %v210_v0 = vperm.slane %v184_v63, 0 }
 0x1c4   :  { %v211_v2 = vmul.f32 %v210_v0, %v521_v17 }
 0x1c9   :  { %v207_v1 = vpop.f32.mrf.mxu3 }
 0x1ca   :  { %v212_v3 = vperm.slane %v207_v1, 0 }
 0x1cc   :  { %v213_v4 = vadd.f32 %v212_v3, %v211_v2 }
 0x1ce   :  { %v214_v5 = vmax.f32 %v213_v4, 0.0 }
 0x1d0   :  { %400 = vmatmul.msk.f32.vlgmr.msra.gmra.mxu3 %vm47_vm0, %v214_v5 }
 0x253   :  { %v243_v13 = vpop.f32.mrf.mxu3 }
 0x254   :  { %v246_v14 = vsel %vm71_vm1, %v243_v13, 0.0  ;;  %v253_v15 = vmul.f32 %v243_v13, %v243_v13 }
 0x255   :  { %v247_v16 = vrot.slane %v246_v14, 4 }
 0x256   :  { %v254_v17 = vsel %vm71_vm1, %v253_v15, 0.0 }
 0x257   :  { %v248_v18 = vadd.f32 %v247_v16, %v246_v14  ;;  %v255_v19 = vrot.slane %v254_v17, 4 }
 0x259   :  { %v249_v20 = vrot.slane %v248_v18, 2  ;;  %v256_v21 = vadd.f32 %v255_v19, %v254_v17 }
 0x25b   :  { %v250_v22 = vadd.f32 %v249_v20, %v248_v18  ;;  %v257_v23 = vrot.slane %v256_v21, 2 }
 0x25d   :  { %v251_v24 = vrot.slane %v250_v22, 1  ;;  %v258_v25 = vadd.f32 %v257_v23, %v256_v21 }
 0x25f   :  { %v252_v26 = vadd.f32 %v251_v24, %v250_v22  ;;  %v259_v27 = vrot.slane %v258_v25, 1 }
 0x261   :  { %401 = vmatmul.msk.f32.vlgmr.msrb.gmra.mxu0 %vm47_vm0, %v252_v26  ;;  %v260_v28 = vadd.f32 %v259_v27, %v258_v25 }
 0x263   :  { %402 = vmatmul.msk.f32.vlgmr.msrb.gmra.mxu1 %vm47_vm0, %v260_v28 }
 0x2de   :  { %v289_v31 = vpop.f32.mrf.mxu0 }
 0x2df   :  { %v315_v32 = vmul.f32 0.125, %v289_v31 }
 0x2e0   :  { %v312_v33 = vpop.f32.mrf.mxu1 }
 0x2e1   :  { %v317_v34 = vmul.f32 %v315_v32, %v315_v32  ;;  %v316_v35 = vmul.f32 0.125, %v312_v33 }
 0x2e3   :  { %v318_v36 = vsub.f32 %v316_v35, %v317_v34 }
 0x2e5   :  { %v319_v37 = vmax.f32 %v318_v36, 0.0 }
 0x2e7   :  { %v321_v38 = vadd.f32 1e-05, %v319_v37 }
 0x2e9   :  { %407 = vrsqrt.f32 %v321_v38  ;;  %vm328_vm7 = vweird.f32 %v321_v38 }
 0x2ef   :  { %v408_v39 = vpop.eup %407 }
 0x2f0   :  { %v323_v40 = vmul.f32 %v408_v39, %v321_v38  ;;  %vm329_vm6 = vweird.f32 %v408_v39 }
 0x2f1   :  { %vm330_vm8 = vmor %vm328_vm7, %vm329_vm6 }
 0x2f2   :  { %v324_v41 = vmul.f32 %v408_v39, %v323_v40 }
 0x2f4   :  { %v325_v42 = vmul.f32 0.5, %v324_v41 }
 0x2f6   :  { %v326_v43 = vsub.f32 1.5, %v325_v42 }
 0x2f8   :  { %v327_v44 = vmul.f32 %v408_v39, %v326_v43 }
 0x2fa   :  { %v331_v46 = vsel %vm330_vm8, %v408_v39, %v327_v44 }
 0x2fb   :  { %v332_v47 = vmul.f32 %v331_v46, %v320_v45 }
 0x2fd   :  { %403 = vmatmul.msk.f32.vlgmr.msrb.gmra.mxu2 %vm338_vm9, %v332_v47  ;;  %v334_v48 = vmul.f32 %v332_v47, %v315_v32 }
 0x2ff   :  { %v335_v50 = vsub.f32 %v333_v49, %v334_v48 }
 0x305   :  { %404 = vmatmul.msk.f32.vlgmr.msra.gmra.mxu2 %vm338_vm9, %v335_v50 }
 0x380   :  { %v359_v51 = vpop.f32.mrf.mxu2 }
 0x381   :  { %v385_v52 = vperm.slane %v359_v51, 0 }
 0x383   :  { %v386_v54 = vmul.f32 %v385_v52, %v243_v13 }
 0x388   :  { %v382_v53 = vpop.f32.mrf.mxu2 }
 0x389   :  { %v387_v55 = vperm.slane %v382_v53, 0 }
 0x38b   :  { %v388_v56 = vadd.f32 %v387_v55, %v386_v54 }
 0x38d   :  { %v389_v57 = vmax.f32 %v388_v56, 0.0 }
 0x38f   :  { %390 = vst.msk [vmem:[%s620_s11] sm:$0x3] %vm71_vm1, %v389_v57 }

</bundles_post_ra>
